<compile_context>
chip_gen: v5e
topology: v5e:2x2
jax: 0.10.0
libtpu: 0.0.40
codegen_flags: <defaults>
</compile_context>

<pallas_src>
import functools

import jax
import jax.numpy as jnp
from jax import lax
from jax.experimental import pallas as pl
from jax.experimental.pallas import tpu as pltpu

EPS = 1e-5  # nn.BatchNorm2d default eps


def _fused_conv_bn_relu_kernel(x_ref, w_ref, gamma_ref, beta_ref, out_ref,
                               mom_ref, *, img_h, width, cout, inv_count):
    # x_ref    : (B, H, W*Cin)      bf16  batch of NHWC images, (W,Cin) in lanes
    # w_ref    : (3*W*Cin, W*Cout)  bf16  banded block-Toeplitz conv weight
    # gamma_ref: (1, W*Cout)        f32   BN gamma, tiled lane-dense
    # beta_ref : (1, W*Cout)        f32   BN beta,  tiled lane-dense
    # out_ref  : (N*H, W*Cout)      out dtype, resident across the whole grid
    # mom_ref  : (2, W*Cout)        f32   scratch: running [sum, sum_sq]
    g = pl.program_id(0)
    b = x_ref.shape[0]
    h = img_h
    wcin = x_ref.shape[2]
    bh = b * h

    @pl.when(g == 0)
    def _():
        mom_ref[...] = jnp.zeros_like(mom_ref)

    # ---- conv3x3 as ONE MXU matmul: M = B*H, K = 3*W*Cin, N = W*Cout ----
    # Height padding / row shifts: concat two zero rows (f32 round-trip is
    # lossless for bf16 values and keeps the sublane concat Mosaic-friendly),
    # then mask the per-image border rows so images in the batch don't bleed.
    x = x_ref[...].reshape(bh, wcin)                      # (B*H, W*Cin) bf16
    zrow = jnp.zeros((1, wcin), jnp.float32)
    xpad = jnp.concatenate([zrow, x.astype(jnp.float32), zrow], axis=0)
    xb = xpad.astype(jnp.bfloat16)                        # (B*H+2, W*Cin)

    row = lax.broadcasted_iota(jnp.int32, (bh, 1), 0)
    up = xb[0:bh]                                         # row r -> x[r-1]
    up = jnp.where(row % h == 0, jnp.zeros_like(up), up)
    dn = xb[2:bh + 2]                                     # row r -> x[r+1]
    dn = jnp.where(row % h == h - 1, jnp.zeros_like(dn), dn)
    lhs = jnp.concatenate([up, xb[1:bh + 1], dn], axis=1)  # (B*H, 3*W*Cin)

    acc = jnp.dot(lhs, w_ref[...], preferred_element_type=jnp.float32)

    # ---- partial BN moments (f32), accumulated in VMEM scratch ----
    s = jnp.sum(acc, axis=0, keepdims=True)               # (1, W*Cout)
    ss = jnp.sum(acc * acc, axis=0, keepdims=True)        # (1, W*Cout)
    mom_ref[...] = mom_ref[...] + jnp.concatenate([s, ss], axis=0)

    # ---- stash this batch's conv rows into the resident output block ----
    r0 = pl.multiple_of(g * bh, bh)
    out_ref[pl.ds(r0, bh), :] = acc.astype(out_ref.dtype)

    # ---- last step: finalize batch stats and apply BN + ReLU in place ----
    @pl.when(g == pl.num_programs(0) - 1)
    def _():
        # Cyclic lane butterfly (XLU rolls): after log2(W) steps every lane
        # w*Cout+co holds the total over all lanes congruent mod Cout, i.e.
        # the per-channel [sum, sum_sq], already lane-aligned with y.
        tot = mom_ref[...]
        k = width // 2
        while k >= 1:                                     # static python loop
            tot = tot + pltpu.roll(tot, shift=cout * k, axis=1)
            k //= 2
        mean_l = tot[0:1, :] * inv_count
        var_l = jnp.maximum(tot[1:2, :] * inv_count - mean_l * mean_l, 0.0)
        scale_l = gamma_ref[...] * lax.rsqrt(var_l + EPS)
        shift_l = beta_ref[...] - mean_l * scale_l
        y = out_ref[...].astype(jnp.float32)
        out_ref[...] = jnp.maximum(y * scale_l + shift_l, 0.0).astype(out_ref.dtype)


def _images_per_step(n, h, target_rows=256):
    """Most images per grid step (M ~ target_rows) that divides N."""
    b = max(1, min(n, max(1, target_rows // h)))
    while n % b:
        b -= 1
    return b


@jax.jit
def basic_block(x_nchw, w_oihw, gamma, beta):
    """BasicBlock forward. x_nchw: (N,Cin,H,W); w_oihw: (Cout,Cin,3,3)."""
    N, Cin, H, W = x_nchw.shape
    Cout = w_oihw.shape[0]
    assert W & (W - 1) == 0, "lane-butterfly channel reduction needs power-of-two W"

    # --- layout plumbing (XLA): NCHW -> (N, H, W*Cin), emitted directly in
    #     bf16 (the transpose writes the array anyway; halves its HBM bytes).
    x3 = jnp.transpose(x_nchw, (0, 2, 3, 1)).reshape(N, H, W * Cin)
    x3 = x3.astype(jnp.bfloat16)

    # --- banded (block-Toeplitz) weight, flattened to a single K axis:
    #     band[kh*W*Cin + wi*Cin + ci, wo*Cout + co] = w[co, ci, kh, wi-wo+1]
    #     when |wi-wo| <= 1, else 0 (folds kw contraction + width padding).
    kw = jnp.arange(3)[:, None, None]
    wo = jnp.arange(W)[None, :, None]
    wi = jnp.arange(W)[None, None, :]
    sel = (wi == wo + kw - 1).astype(jnp.float32)                  # (3, W, W)
    wband = jnp.einsum('xwp,oiyx->ypiwo', sel, w_oihw.astype(jnp.float32))
    wband = wband.reshape(3 * W * Cin, W * Cout).astype(jnp.bfloat16)

    # BN affine parameters tiled lane-dense (lane w*Cout+co -> channel co).
    gamma_l = jnp.tile(gamma.astype(jnp.float32), W).reshape(1, W * Cout)
    beta_l = jnp.tile(beta.astype(jnp.float32), W).reshape(1, W * Cout)

    B = _images_per_step(N, H)
    rows = N * H
    count = float(N * H * W)

    kernel = functools.partial(
        _fused_conv_bn_relu_kernel,
        img_h=H, width=W, cout=Cout, inv_count=1.0 / count)

    # Accurate cost: FLOPs of the banded matmul actually executed (not dense
    # conv), plus the (small) moment / normalize VPU work.
    cost = pl.CostEstimate(
        flops=2 * rows * (3 * W * Cin) * (W * Cout) + 6 * rows * W * Cout,
        transcendentals=W * Cout,
        bytes_accessed=(2 * x3.size + 2 * wband.size
                        + 4 * (gamma_l.size + beta_l.size)
                        + rows * W * Cout * x_nchw.dtype.itemsize))

    out_flat = pl.pallas_call(
        kernel,
        grid=(N // B,),
        in_specs=[
            pl.BlockSpec((B, H, W * Cin), lambda g: (g, 0, 0)),
            # Constant index map -> band stays resident, never re-fetched.
            pl.BlockSpec((3 * W * Cin, W * Cout), lambda g: (0, 0)),
            pl.BlockSpec((1, W * Cout), lambda g: (0, 0)),
            pl.BlockSpec((1, W * Cout), lambda g: (0, 0)),
        ],
        # Output block = whole array, constant index map: stays resident in
        # VMEM across grid steps and is written back once after the finalize.
        out_specs=pl.BlockSpec((rows, W * Cout), lambda g: (0, 0)),
        out_shape=jax.ShapeDtypeStruct((rows, W * Cout), x_nchw.dtype),
        scratch_shapes=[pltpu.VMEM((2, W * Cout), jnp.float32)],
        compiler_params=pltpu.CompilerParams(
            dimension_semantics=("arbitrary",),      # sequential accumulation
            vmem_limit_bytes=32 * 1024 * 1024),
        cost_estimate=cost,
    )(x3, wband, gamma_l, beta_l)

    out = out_flat.reshape(N, H, W, Cout)
    return jnp.transpose(out, (0, 3, 1, 2))                        # back to NCHW


def _reference(x, w, gamma, beta):
    """Pure-JAX f32 reference: conv3x3(pad=1) -> BN(batch stats) -> ReLU."""
    conv = lax.conv_general_dilated(
        x, w, window_strides=(1, 1), padding=((1, 1), (1, 1)),
        dimension_numbers=('NCHW', 'OIHW', 'NCHW'),
        precision=lax.Precision.HIGHEST)
    mean = conv.mean(axis=(0, 2, 3), keepdims=True)
    var = ((conv - mean) ** 2).mean(axis=(0, 2, 3), keepdims=True)
    y = (conv - mean) * lax.rsqrt(var + EPS)
    y = y * gamma.reshape(1, -1, 1, 1) + beta.reshape(1, -1, 1, 1)
    return jnp.maximum(y, 0.0)


if __name__ == "__main__":
    key = jax.random.PRNGKey(0)
    k_x, k_w = jax.random.split(key)

    # Small shapes consistent with BasicBlock(in_planes=4, planes=8, stride=1)
    N, Cin, H, W, Cout = 2, 4, 16, 16, 8

    x = jax.random.normal(k_x, (N, Cin, H, W), jnp.float32)
    bound = 1.0 / (Cin * 9) ** 0.5
    w = jax.random.uniform(k_w, (Cout, Cin, 3, 3), jnp.float32, -bound, bound)
    gamma = jnp.ones((Cout,), jnp.float32)   # bn1.weight default
    beta = jnp.zeros((Cout,), jnp.float32)   # bn1.bias default

    out = basic_block(x, w, gamma, beta)
    jax.block_until_ready(out)
    assert out.shape == (N, Cout, H, W)
    assert bool(jnp.all(out >= 0.0))         # ReLU sanity check

    # Structural check: reference using the same bf16 operand rounding as the MXU.
    ref_bf16 = _reference(x.astype(jnp.bfloat16).astype(jnp.float32),
                          w.astype(jnp.bfloat16).astype(jnp.float32), gamma, beta)
    err_struct = float(jnp.max(jnp.abs(out - ref_bf16)))
    assert err_struct < 2e-3, f"structural max abs err {err_struct}"

    # Fidelity check vs full-f32 PyTorch-style forward (bf16 operand rounding only).
    ref_f32 = _reference(x, w, gamma, beta)
    err_f32 = float(jnp.max(jnp.abs(out - ref_f32)))
    assert err_f32 < 1e-1, f"f32 max abs err {err_f32}"

    print("KERNEL_OK")
</pallas_src>

<mosaic_0001>
module attributes {stable_mosaic.version = 11 : i64} {
  func.func @_fused_conv_bn_relu_kernel(%arg0: i32, %arg1: memref<2x16x64xbf16, #tpu.memory_space<vmem>>, %arg2: memref<192x128xbf16, #tpu.memory_space<vmem>>, %arg3: memref<1x128xf32, #tpu.memory_space<vmem>>, %arg4: memref<1x128xf32, #tpu.memory_space<vmem>>, %arg5: memref<32x128xf32, #tpu.memory_space<vmem>>, %arg6: memref<2x128xf32, #tpu.memory_space<vmem>>) attributes {dimension_semantics = [#tpu.dimension_semantics<arbitrary>], iteration_bounds = array<i64: 1>, scalar_prefetch = 0 : i64, scratch_operands = 1 : i64, tpu.core_type = #tpu.core_type<tc>, window_params = [{transform_indices = @transform_0, window_bounds = array<i64: 2, 16, 64>}, {pipeline_mode = #tpu.pipeline_mode<synchronous>, transform_indices = @transform_1, window_bounds = array<i64: 192, 128>}, {pipeline_mode = #tpu.pipeline_mode<synchronous>, transform_indices = @transform_2, window_bounds = array<i64: 1, 128>}, {pipeline_mode = #tpu.pipeline_mode<synchronous>, transform_indices = @transform_3, window_bounds = array<i64: 1, 128>}, {pipeline_mode = #tpu.pipeline_mode<synchronous>, transform_indices = @transform_4, window_bounds = array<i64: 32, 128>}]} {
    %c0_i32 = arith.constant 0 : i32
    %0 = arith.cmpi eq, %arg0, %c0_i32 : i32
    %1 = arith.extui %0 : i1 to i32
    %c0_i32_0 = arith.constant 0 : i32
    %2 = arith.cmpi ne, %1, %c0_i32_0 : i32
    scf.if %2 {
      %cst_28 = arith.constant 0.000000e+00 : f32
      %76 = vector.broadcast %cst_28 : f32 to vector<2x128xf32>
      %c0_29 = arith.constant 0 : index
      %c0_30 = arith.constant 0 : index
      %77 = vector.load %arg6[%c0_29, %c0_30] : memref<2x128xf32, #tpu.memory_space<vmem>>, vector<2x128xf32>
      tpu.vector_store %arg6[%c0_29, %c0_30], %76 {strides = array<i32>} : memref<2x128xf32, #tpu.memory_space<vmem>>, vector<2x128xf32>,
    } else {
    }
    %c0 = arith.constant 0 : index
    %c0_1 = arith.constant 0 : index
    %c0_2 = arith.constant 0 : index
    %3 = vector.load %arg1[%c0, %c0_1, %c0_2] : memref<2x16x64xbf16, #tpu.memory_space<vmem>>, vector<2x16x64xbf16>
    %4 = vector.shape_cast %3 : vector<2x16x64xbf16> to vector<32x64xbf16>
    %cst = arith.constant 0.000000e+00 : f32
    %5 = vector.broadcast %cst : f32 to vector<1x64xf32>
    %6 = arith.extf %4 : vector<32x64xbf16> to vector<32x64xf32>
    %7 = tpu.concatenate %5, %6, %5 in 0 : vector<1x64xf32>, vector<32x64xf32>, vector<1x64xf32> -> vector<34x64xf32>
    %8 = arith.truncf %7 : vector<34x64xf32> to vector<34x64xbf16>
    %9 = tpu.iota {dimensions = array<i32: 0>} : vector<32x1xi32>
    %10 = vector.extract_strided_slice %8 {offsets = [0, 0], sizes = [32, 64], strides = [1, 1]} : vector<34x64xbf16> to vector<32x64xbf16>
    %c16_i32 = arith.constant 16 : i32
    %c0_i32_3 = arith.constant 0 : i32
    %11 = arith.cmpi eq, %c16_i32, %c0_i32_3 : i32
    %c1_i32 = arith.constant 1 : i32
    %12 = arith.select %11, %c1_i32, %c16_i32 : i32
    %13 = vector.broadcast %12 : i32 to vector<32x1xi32>
    %14 = arith.remsi %9, %13 : vector<32x1xi32>
    %c0_i32_4 = arith.constant 0 : i32
    %15 = vector.broadcast %c0_i32_4 : i32 to vector<32x1xi32>
    %16 = arith.cmpi ne, %14, %15 : vector<32x1xi32>
    %c0_i32_5 = arith.constant 0 : i32
    %17 = vector.broadcast %c0_i32_5 : i32 to vector<32x1xi32>
    %18 = arith.cmpi slt, %14, %17 : vector<32x1xi32>
    %c0_i32_6 = arith.constant 0 : i32
    %19 = arith.cmpi slt, %12, %c0_i32_6 : i32
    %20 = vector.broadcast %19 : i1 to vector<32x1xi1>
    %21 = vector.broadcast %20 : vector<32x1xi1> to vector<32x1xi1>
    %22 = arith.xori %18, %21 : vector<32x1xi1>
    %23 = arith.andi %22, %16 : vector<32x1xi1>
    %24 = vector.broadcast %12 : i32 to vector<32x1xi32>
    %25 = arith.addi %14, %24 : vector<32x1xi32>
    %26 = arith.select %23, %25, %14 : vector<32x1xi1>, vector<32x1xi32>
    %c0_i32_7 = arith.constant 0 : i32
    %27 = vector.broadcast %c0_i32_7 : i32 to vector<32x1xi32>
    %28 = arith.cmpi eq, %26, %27 : vector<32x1xi32>
    %cst_8 = arith.constant 0.000000e+00 : bf16
    %29 = vector.broadcast %cst_8 : bf16 to vector<32x64xbf16>
    %30 = vector.shape_cast %28 : vector<32x1xi1> to vector<32x1xi1>
    %31 = vector.broadcast %30 : vector<32x1xi1> to vector<32x64xi1>
    %32 = arith.select %31, %29, %10 : vector<32x64xi1>, vector<32x64xbf16>
    %33 = vector.extract_strided_slice %8 {offsets = [2, 0], sizes = [32, 64], strides = [1, 1]} : vector<34x64xbf16> to vector<32x64xbf16>
    %c16_i32_9 = arith.constant 16 : i32
    %c0_i32_10 = arith.constant 0 : i32
    %34 = arith.cmpi eq, %c16_i32_9, %c0_i32_10 : i32
    %c1_i32_11 = arith.constant 1 : i32
    %35 = arith.select %34, %c1_i32_11, %c16_i32_9 : i32
    %36 = vector.broadcast %35 : i32 to vector<32x1xi32>
    %37 = arith.remsi %9, %36 : vector<32x1xi32>
    %c0_i32_12 = arith.constant 0 : i32
    %38 = vector.broadcast %c0_i32_12 : i32 to vector<32x1xi32>
    %39 = arith.cmpi ne, %37, %38 : vector<32x1xi32>
    %c0_i32_13 = arith.constant 0 : i32
    %40 = vector.broadcast %c0_i32_13 : i32 to vector<32x1xi32>
    %41 = arith.cmpi slt, %37, %40 : vector<32x1xi32>
    %c0_i32_14 = arith.constant 0 : i32
    %42 = arith.cmpi slt, %35, %c0_i32_14 : i32
    %43 = vector.broadcast %42 : i1 to vector<32x1xi1>
    %44 = vector.broadcast %43 : vector<32x1xi1> to vector<32x1xi1>
    %45 = arith.xori %41, %44 : vector<32x1xi1>
    %46 = arith.andi %45, %39 : vector<32x1xi1>
    %47 = vector.broadcast %35 : i32 to vector<32x1xi32>
    %48 = arith.addi %37, %47 : vector<32x1xi32>
    %49 = arith.select %46, %48, %37 : vector<32x1xi1>, vector<32x1xi32>
    %c15_i32 = arith.constant 15 : i32
    %50 = vector.broadcast %c15_i32 : i32 to vector<32x1xi32>
    %51 = arith.cmpi eq, %49, %50 : vector<32x1xi32>
    %cst_15 = arith.constant 0.000000e+00 : bf16
    %52 = vector.broadcast %cst_15 : bf16 to vector<32x64xbf16>
    %53 = vector.shape_cast %51 : vector<32x1xi1> to vector<32x1xi1>
    %54 = vector.broadcast %53 : vector<32x1xi1> to vector<32x64xi1>
    %55 = arith.select %54, %52, %33 : vector<32x64xi1>, vector<32x64xbf16>
    %56 = vector.extract_strided_slice %8 {offsets = [1, 0], sizes = [32, 64], strides = [1, 1]} : vector<34x64xbf16> to vector<32x64xbf16>
    %57 = tpu.concatenate %32, %56, %55 in 1 : vector<32x64xbf16>, vector<32x64xbf16>, vector<32x64xbf16> -> vector<32x192xbf16>
    %c0_16 = arith.constant 0 : index
    %c0_17 = arith.constant 0 : index
    %58 = vector.load %arg2[%c0_16, %c0_17] : memref<192x128xbf16, #tpu.memory_space<vmem>>, vector<192x128xbf16>
    %cst_18 = arith.constant dense<0.000000e+00> : vector<32x128xf32>
    %59 = tpu.matmul %57, %58, %cst_18 {dimension_numbers = #tpu.dot_dimension_numbers<[1], [0], [0], [1], [0, 0, 1, 1], [], []>} : vector<32x192xbf16>, vector<192x128xbf16>, vector<32x128xf32> -> vector<32x128xf32>
    %cst_19 = arith.constant dense<0.000000e+00> : vector<128xf32>
    %60 = vector.multi_reduction <add>, %59, %cst_19 [0] : vector<32x128xf32> to vector<128xf32>
    %61 = vector.shape_cast %60 : vector<128xf32> to vector<1x128xf32>
    %62 = arith.mulf %59, %59 : vector<32x128xf32>
    %cst_20 = arith.constant dense<0.000000e+00> : vector<128xf32>
    %63 = vector.multi_reduction <add>, %62, %cst_20 [0] : vector<32x128xf32> to vector<128xf32>
    %64 = vector.shape_cast %63 : vector<128xf32> to vector<1x128xf32>
    %c0_21 = arith.constant 0 : index
    %c0_22 = arith.constant 0 : index
    %65 = vector.load %arg6[%c0_21, %c0_22] : memref<2x128xf32, #tpu.memory_space<vmem>>, vector<2x128xf32>
    %66 = tpu.concatenate %61, %64 in 0 : vector<1x128xf32>, vector<1x128xf32> -> vector<2x128xf32>
    %67 = arith.addf %65, %66 : vector<2x128xf32>
    %c0_23 = arith.constant 0 : index
    %c0_24 = arith.constant 0 : index
    %68 = vector.load %arg6[%c0_23, %c0_24] : memref<2x128xf32, #tpu.memory_space<vmem>>, vector<2x128xf32>
    tpu.vector_store %arg6[%c0_23, %c0_24], %67 {strides = array<i32>} : memref<2x128xf32, #tpu.memory_space<vmem>>, vector<2x128xf32>,
    %c32_i32 = arith.constant 32 : i32
    %69 = arith.muli %arg0, %c32_i32 : i32
    %70 = tpu.assume_multiple %69, 32 : i32
    %71 = arith.index_cast %70 : i32 to index
    %c0_25 = arith.constant 0 : index
    %72 = vector.load %arg5[%71, %c0_25] : memref<32x128xf32, #tpu.memory_space<vmem>>, vector<32x128xf32>
    tpu.vector_store %arg5[%71, %c0_25], %59 {strides = array<i32>} : memref<32x128xf32, #tpu.memory_space<vmem>>, vector<32x128xf32>,
    %c0_i32_26 = arith.constant 0 : i32
    %73 = arith.cmpi eq, %arg0, %c0_i32_26 : i32
    %74 = arith.extui %73 : i1 to i32
    %c0_i32_27 = arith.constant 0 : i32
    %75 = arith.cmpi ne, %74, %c0_i32_27 : i32
    scf.if %75 {
      %c0_28 = arith.constant 0 : index
      %c0_29 = arith.constant 0 : index
      %76 = vector.load %arg6[%c0_28, %c0_29] : memref<2x128xf32, #tpu.memory_space<vmem>>, vector<2x128xf32>
      %c64_i32 = arith.constant 64 : i32
      %77 = tpu.dynamic_rotate %76 by %c64_i32 dim 1 : vector<2x128xf32>, i32 -> vector<2x128xf32>
      %78 = arith.addf %76, %77 : vector<2x128xf32>
      %c32_i32_30 = arith.constant 32 : i32
      %79 = tpu.dynamic_rotate %78 by %c32_i32_30 dim 1 : vector<2x128xf32>, i32 -> vector<2x128xf32>
      %80 = arith.addf %78, %79 : vector<2x128xf32>
      %c16_i32_31 = arith.constant 16 : i32
      %81 = tpu.dynamic_rotate %80 by %c16_i32_31 dim 1 : vector<2x128xf32>, i32 -> vector<2x128xf32>
      %82 = arith.addf %80, %81 : vector<2x128xf32>
      %c8_i32 = arith.constant 8 : i32
      %83 = tpu.dynamic_rotate %82 by %c8_i32 dim 1 : vector<2x128xf32>, i32 -> vector<2x128xf32>
      %84 = arith.addf %82, %83 : vector<2x128xf32>
      %85 = vector.extract_strided_slice %84 {offsets = [0, 0], sizes = [1, 128], strides = [1, 1]} : vector<2x128xf32> to vector<1x128xf32>
      %cst_32 = arith.constant 0.001953125 : f32
      %86 = vector.broadcast %cst_32 : f32 to vector<1x128xf32>
      %87 = arith.mulf %85, %86 : vector<1x128xf32>
      %88 = vector.extract_strided_slice %84 {offsets = [1, 0], sizes = [1, 128], strides = [1, 1]} : vector<2x128xf32> to vector<1x128xf32>
      %cst_33 = arith.constant 0.001953125 : f32
      %89 = vector.broadcast %cst_33 : f32 to vector<1x128xf32>
      %90 = arith.mulf %88, %89 : vector<1x128xf32>
      %91 = arith.mulf %87, %87 : vector<1x128xf32>
      %92 = arith.subf %90, %91 : vector<1x128xf32>
      %cst_34 = arith.constant 0.000000e+00 : f32
      %93 = vector.broadcast %cst_34 : f32 to vector<1x128xf32>
      %94 = arith.maximumf %92, %93 : vector<1x128xf32>
      %c0_35 = arith.constant 0 : index
      %c0_36 = arith.constant 0 : index
      %95 = vector.load %arg3[%c0_35, %c0_36] : memref<1x128xf32, #tpu.memory_space<vmem>>, vector<1x128xf32>
      %cst_37 = arith.constant 9.99999974E-6 : f32
      %96 = vector.broadcast %cst_37 : f32 to vector<1x128xf32>
      %97 = arith.addf %94, %96 : vector<1x128xf32>
      %98 = math.rsqrt %97 : vector<1x128xf32>
      %99 = arith.mulf %95, %98 : vector<1x128xf32>
      %c0_38 = arith.constant 0 : index
      %c0_39 = arith.constant 0 : index
      %100 = vector.load %arg4[%c0_38, %c0_39] : memref<1x128xf32, #tpu.memory_space<vmem>>, vector<1x128xf32>
      %101 = arith.mulf %87, %99 : vector<1x128xf32>
      %102 = arith.subf %100, %101 : vector<1x128xf32>
      %c0_40 = arith.constant 0 : index
      %c0_41 = arith.constant 0 : index
      %103 = vector.load %arg5[%c0_40, %c0_41] : memref<32x128xf32, #tpu.memory_space<vmem>>, vector<32x128xf32>
      %104 = vector.broadcast %99 : vector<1x128xf32> to vector<32x128xf32>
      %105 = arith.mulf %103, %104 : vector<32x128xf32>
      %106 = vector.broadcast %102 : vector<1x128xf32> to vector<32x128xf32>
      %107 = arith.addf %105, %106 : vector<32x128xf32>
      %cst_42 = arith.constant 0.000000e+00 : f32
      %108 = vector.broadcast %cst_42 : f32 to vector<32x128xf32>
      %109 = arith.maximumf %107, %108 : vector<32x128xf32>
      %c0_43 = arith.constant 0 : index
      %c0_44 = arith.constant 0 : index
      %110 = vector.load %arg5[%c0_43, %c0_44] : memref<32x128xf32, #tpu.memory_space<vmem>>, vector<32x128xf32>
      tpu.vector_store %arg5[%c0_43, %c0_44], %109 {strides = array<i32>} : memref<32x128xf32, #tpu.memory_space<vmem>>, vector<32x128xf32>,
    } else {
    }
    return
  }
  func.func @transform_0(%arg0: i32) -> (i32, i32, i32) {
    %c0_i32 = arith.constant 0 : i32
    %c0_i32_0 = arith.constant 0 : i32
    %c0_i32_1 = arith.constant 0 : i32
    return %arg0, %c0_i32, %c0_i32_0 : i32, i32, i32
  }
  func.func @transform_1(%arg0: i32) -> (i32, i32) {
    %c0_i32 = arith.constant 0 : i32
    %c0_i32_0 = arith.constant 0 : i32
    %c0_i32_1 = arith.constant 0 : i32
    return %c0_i32, %c0_i32_0 : i32, i32
  }
  func.func @transform_2(%arg0: i32) -> (i32, i32) {
    %c0_i32 = arith.constant 0 : i32
    %c0_i32_0 = arith.constant 0 : i32
    %c0_i32_1 = arith.constant 0 : i32
    return %c0_i32, %c0_i32_0 : i32, i32
  }
  func.func @transform_3(%arg0: i32) -> (i32, i32) {
    %c0_i32 = arith.constant 0 : i32
    %c0_i32_0 = arith.constant 0 : i32
    %c0_i32_1 = arith.constant 0 : i32
    return %c0_i32, %c0_i32_0 : i32, i32
  }
  func.func @transform_4(%arg0: i32) -> (i32, i32) {
    %c0_i32 = arith.constant 0 : i32
    %c0_i32_0 = arith.constant 0 : i32
    %c0_i32_1 = arith.constant 0 : i32
    return %c0_i32, %c0_i32_0 : i32, i32
  }
}

</mosaic_0001>

<bundles_post_ra>
// kernel: tile.13
= control target key start
LH: loop header
LB: loop body
LE: loop exit
PB: predicated region body
PF: predicated region fallthrough
CT: control target
= control target key end

     0   :  { %s28_s0 = inlined_call_operand.vmem [shape: f32[8], index: 0, kind: input, shape index: {}]   ;;  %s29_s1 = inlined_call_operand.vmem [shape: f32[16,8], index: 1, kind: output, shape index: {}]  }
   0x1   :  { %v4_v0 = vld [vmem:[%s28_s0] ss:$0 sm:$0xff] }
   0x2   :  { %5 = vst [vmem:[%s29_s1] sm:$0xff] %v4_v0 }
   0x3   :  { %8 = vst [vmem:[%s29_s1 + $0x8] sm:$0xff] %v4_v0 }

// kernel: tile.14
= control target key start
LH: loop header
LB: loop body
LE: loop exit
PB: predicated region body
PF: predicated region fallthrough
CT: control target
= control target key end

     0   :  { %s131_s10 = smov 120   ;;  %s132_s11 = smov 104   ;;  %vm3_vm0 = vcmask 64512   ;;  %vm9_vm1 = vcmask 1048512   ;;  %vm15_vm2 = vcmask 982912   ;;  %vm21_vm3 = vcmask 917312   ;;  %s207_s0 = inlined_call_operand.vmem [shape: f32[16,8], index: 0, kind: input, shape index: {}]   ;;  %s208_s1 = inlined_call_operand.vmem [shape: f32[1,128], index: 1, kind: output, shape index: {}]  }
   0x1   :  { %v101_v0 = vld [vmem:[%s207_s0 + $0xf] sm:$0x1]   ;;  %v103_v1 = vld [vmem:[%s207_s0 + $0xd] sm:$0x1]   ;;  %v105_v2 = vld [vmem:[%s207_s0 + $0xb] sm:$0x1]  }
   0x2   :  { %7 = vrot.lane.b32.xlu0 %v101_v0, %s131_s10  ;;  %19 = vrot.lane.b32.xlu1 %v103_v1, %s132_s11  ;;  %s133_s14 = smov 88   ;;  %v102_v3 = vld [vmem:[%s207_s0 + $0xe] sm:$0x1]   ;;  %v104_v4 = vld [vmem:[%s207_s0 + $0xc] sm:$0x1]   ;;  %s134_s19 = smov 112  }
   0x3   :  { %31 = vrot.lane.b32.xlu2 %v105_v2, %s133_s14  ;;  %s135_s20 = smov 96   ;;  %v106_v5 = vld [vmem:[%s207_s0 + $0xa] sm:$0x1]   ;;  %s136_s23 = smov 80   ;;  %v107_v6 = vld [vmem:[%s207_s0 + $0x9] sm:$0x1]  }
   0x4   :  { %v108_v7 = vld [vmem:[%s207_s0 + $0x8] sm:$0x1]   ;;  %s137_s28 = smov 72   ;;  %s138_s29 = smov 64   ;;  %v109_v8 = vld [vmem:[%s207_s0 + $0x7] sm:$0x1]  }
   0x5   :  { %s139_s3 = smov 56   ;;  %v110_v9 = vld [vmem:[%s207_s0 + $0x6] sm:$0x1]   ;;  %v111_v10 = vld [vmem:[%s207_s0 + $0x5] sm:$0x1]   ;;  %s140_s8 = smov 48  }
   0x6   :  { %s141_s9 = smov 40   ;;  %v112_v11 = vld [vmem:[%s207_s0 + $0x4] sm:$0x1]   ;;  %s142_s12 = smov 32   ;;  %v113_v12 = vld [vmem:[%s207_s0 + $0x3] sm:$0x1]  }
   0x7   :  { %v114_v13 = vld [vmem:[%s207_s0 + $0x2] sm:$0x1]   ;;  %s143_s17 = smov 24   ;;  %s144_s18 = smov 16   ;;  %v115_v14 = vld [vmem:[%s207_s0 + $0x1] sm:$0x1]  }
   0x8   :  { %s145_s21 = smov 8   ;;  %v2_v15 = vld [vmem:[%s207_s0] sm:$0x1]   ;;  %vm27_vm4 = vcmask 851712   ;;  %vm33_vm5 = vcmask 786112   ;;  %vm39_vm6 = vcmask 720512  }
   0x9   :  { %4 = vst.msk [vmem:[#allocation0] sm:$0x1] %vm3_vm0, %v2_v15   ;;  %vm45_vm7 = vcmask 654912   ;;  %vm51_vm8 = vcmask 589312   ;;  %vm57_vm9 = vcmask 523712   ;;  %vm63_vm10 = vcmask 458112  }
   0xa   :  { %13 = vrot.lane.b32.xlu0 %v102_v3, %s134_s19  ;;  %25 = vrot.lane.b32.xlu1 %v104_v4, %s135_s20  ;;  %vm69_vm11 = vcmask 392512   ;;  %vm75_vm12 = vcmask 326912   ;;  %vm81_vm13 = vcmask 261312   ;;  %vm87_vm14 = vcmask 195712  }
   0xb   :  { %37 = vrot.lane.b32.xlu2 %v106_v5, %s136_s23  ;;  %vm93_vm15 = vcmask 130112  }
  0x12   :  { %43 = vrot.lane.b32.xlu0 %v107_v6, %s137_s28  ;;  %49 = vrot.lane.b32.xlu1 %v108_v7, %s138_s29 }
  0x13   :  { %55 = vrot.lane.b32.xlu2 %v109_v8, %s139_s3 }
  0x1a   :  { %61 = vrot.lane.b32.xlu0 %v110_v9, %s140_s8  ;;  %67 = vrot.lane.b32.xlu1 %v111_v10, %s141_s9 }
  0x1b   :  { %73 = vrot.lane.b32.xlu2 %v112_v11, %s142_s12 }
  0x22   :  { %79 = vrot.lane.b32.xlu0 %v113_v12, %s143_s17  ;;  %85 = vrot.lane.b32.xlu1 %v114_v13, %s144_s18 }
  0x23   :  { %91 = vrot.lane.b32.xlu2 %v115_v14, %s145_s21 }
  0x5d   :  { %v32_v16 = vpop.permute.xlu2 %31  }
  0x65   :  { %v38_v17 = vpop.permute.xlu2 %37  }
  0x6d   :  { %v56_v18 = vpop.permute.xlu2 %55  }
  0x74   :  { %v8_v19 = vpop.permute.xlu0 %7   ;;  %v20_v20 = vpop.permute.xlu1 %19  }
  0x75   :  { %10 = vst.msk [vmem:[#allocation0] sm:$0x1] %vm9_vm1, %v8_v19   ;;  %v74_v21 = vpop.permute.xlu2 %73  }
  0x7c   :  { %v14_v22 = vpop.permute.xlu0 %13   ;;  %v26_v23 = vpop.permute.xlu1 %25  }
  0x7d   :  { %16 = vst.msk [vmem:[#allocation0] sm:$0x1] %vm15_vm2, %v14_v22   ;;  %v92_v24 = vpop.permute.xlu2 %91  }
  0x7e   :  { %22 = vst.msk [vmem:[#allocation0] sm:$0x1] %vm21_vm3, %v20_v20  }
  0x7f   :  { %28 = vst.msk [vmem:[#allocation0] sm:$0x1] %vm27_vm4, %v26_v23  }
  0x80   :  { %34 = vst.msk [vmem:[#allocation0] sm:$0x1] %vm33_vm5, %v32_v16  }
  0x81   :  { %40 = vst.msk [vmem:[#allocation0] sm:$0x1] %vm39_vm6, %v38_v17  }
  0x84   :  { %v44_v25 = vpop.permute.xlu0 %43   ;;  %v50_v26 = vpop.permute.xlu1 %49  }
  0x85   :  { %46 = vst.msk [vmem:[#allocation0] sm:$0x1] %vm45_vm7, %v44_v25  }
  0x86   :  { %52 = vst.msk [vmem:[#allocation0] sm:$0x1] %vm51_vm8, %v50_v26  }
  0x87   :  { %58 = vst.msk [vmem:[#allocation0] sm:$0x1] %vm57_vm9, %v56_v18  }
  0x8c   :  { %v62_v27 = vpop.permute.xlu0 %61   ;;  %v68_v28 = vpop.permute.xlu1 %67  }
  0x8d   :  { %64 = vst.msk [vmem:[#allocation0] sm:$0x1] %vm63_vm10, %v62_v27  }
  0x8e   :  { %70 = vst.msk [vmem:[#allocation0] sm:$0x1] %vm69_vm11, %v68_v28  }
  0x8f   :  { %76 = vst.msk [vmem:[#allocation0] sm:$0x1] %vm75_vm12, %v74_v21  }
  0x94   :  { %v80_v29 = vpop.permute.xlu0 %79   ;;  %v86_v30 = vpop.permute.xlu1 %85  }
  0x95   :  { %82 = vst.msk [vmem:[#allocation0] sm:$0x1] %vm81_vm13, %v80_v29  }
  0x96   :  { %88 = vst.msk [vmem:[#allocation0] sm:$0x1] %vm87_vm14, %v86_v30  }
  0x97   :  { %94 = vst.msk [vmem:[#allocation0] sm:$0x1] %vm93_vm15, %v92_v24  }
  0x9e   :  { %v97_v31 = vld [vmem:[#allocation0] sm:$0x1] }
  0x9f   :  { %100 = vst [vmem:[%s208_s1] sm:$0x1] %v97_v31 }

// kernel: basic_block.1
= control target key start
LH: loop header
LB: loop body
LE: loop exit
PB: predicated region body
PF: predicated region fallthrough
CT: control target
= control target key end

     0   :  { %v57_v0 = vlaneseq  ;;  %vm37_vm0 = vcmask 1040384   ;;  %vm151_vm1 = vcmask 1044484   ;;  %vm614_vm2 = vmmov 0   ;;  %s616_s12 = smov 64   ;;  %s619_s17 = smov 16   ;;  %s833_s0 = inlined_call_operand.vmem [shape: bf16[2,16,64], index: 0, kind: input, shape index: {}]   ;;  %s834_s1 = inlined_call_operand.vmem [shape: bf16[192,128], index: 1, kind: input, shape index: {}]   ;;  %s835_s2 = inlined_call_operand.vmem [shape: f32[1,128], index: 2, kind: input, shape index: {}]   ;;  %s836_s3 = inlined_call_operand.vmem [shape: f32[1,128], index: 3, kind: input, shape index: {}]   ;;  %s837_s4 = inlined_call_operand.vmem [shape: f32[32,128], index: 4, kind: output, shape index: {}]  }
   0x1   :  { %v589_v1 = vld [vmem:[%s833_s0] sm:$0xff]   ;;  %v596_v2 = vld [vmem:[%s833_s0 + $0x8] sm:$0xff]   ;;  %v583_v3 = vld [vmem:[%s834_s1 + $0x38] sm:$0xff]  ;;  %v615_v19 = vmov 0   ;;  %vm227_vm4 = vsmask.f32 7424 }
   0x2   :  { %v591_v4 = vunpack.c.h.bf16 %v589_v1  ;;  %v594_v5 = vunpack.c.l.bf16 %v596_v2  ;;  %v595_v6 = vunpack.c.h.bf16 %v596_v2  ;;  %v590_v7 = vunpack.c.l.bf16 %v589_v1  ;;  %v587_v8 = vld [vmem:[%s834_s1 + $0x58] sm:$0xff]  ;;  %597 = vmatpush.bf16.msra.mxu2 %v583_v3  ;;  %v582_v9 = vld [vmem:[%s834_s1 + $0x30] sm:$0xff]  ;;  %382 = vmatpush.bf16.msra.mxu0 %v583_v3  ;;  %vm666_vm3 = vmpackc.low %vm614_vm2, %vm614_vm2  ;;  %s620_s18 = smov 8  }
   0x3   :  { %v661_v10 = vshrl.u32 %v57_v0, 7  ;;  %405 = vmatpush.bf16.msra.mxu1 %v587_v8  ;;  %v586_v15 = vld [vmem:[%s834_s1 + $0x50] sm:$0xff]  ;;  %v146_v20 = vsel %vm666_vm3, 65537, %v615_v19  ;;  %v674_v21 = vunpack.c.l.b16 %v615_v19  ;;  %v581_v30 = vld [vmem:[%s834_s1 + $0x28] sm:$0xff]  ;;  %v580_v45 = vld [vmem:[%s834_s1 + $0x20] sm:$0xff]  ;;  %v709_v47 = vunpack.c.h.b16 %v615_v19 }
   0x4   :  { %v39_v11 = vrot.slane %v591_v4, 7  ;;  %v41_v12 = vrot.slane %v594_v5, 7  ;;  %v43_v13 = vrot.slane %v595_v6, 7  ;;  %v38_v14 = vrot.slane %v590_v7, 7  ;;  %v585_v33 = vld [vmem:[%s834_s1 + $0x48] sm:$0xff]  ;;  %v584_v49 = vld [vmem:[%s834_s1 + $0x40] sm:$0xff]  ;;  %vm721_vm9 = vmor %vm37_vm0, %vm151_vm1 }
   0x5   :  { %v59_v17 = vadd.s32 8, %v661_v10  ;;  %v61_v18 = vadd.s32 24, %v661_v10  ;;  %v153_v39 = vrot.slane %v146_v20, 7  ;;  %v579_v0 = vld [vmem:[%s834_s1 + $0x18] sm:$0xff] }
   0x6   :  { %v42_v22 = vsel %vm37_vm0, %v39_v11, %v41_v12  ;;  %v44_v23 = vsel %vm37_vm0, %v41_v12, %v43_v13  ;;  %v51_v24 = vsel %vm37_vm0, %v43_v13, 0.0  ;;  %v40_v25 = vsel %vm37_vm0, %v38_v14, %v39_v11  ;;  %598 = vmatpush.bf16.msra.mxu2 %v582_v9  ;;  %383 = vmatpush.bf16.msra.mxu0 %v582_v9 }
   0x7   :  { %v680_v26 = vpack.c.bf16 %v42_v22, %v42_v22  ;;  %v682_v27 = vpack.c.bf16 %v44_v23, %v44_v23  ;;  %v684_v28 = vpack.c.bf16 %v51_v24, %v51_v24  ;;  %v50_v29 = vsel %vm37_vm0, 0.0, %v38_v14  ;;  %406 = vmatpush.bf16.msra.mxu1 %v586_v15 }
   0x8   :  { %v690_v31 = vpack.c.bf16 %v50_v29, %v50_v29  ;;  %v692_v32 = vpack.c.bf16 %v40_v25, %v40_v25  ;;  %v73_v34 = vand.u32 15, %v59_v17  ;;  %v87_v35 = vand.u32 15, %v61_v18  ;;  %v578_v17 = vld [vmem:[%s834_s1 + $0x10] sm:$0xff]  ;;  %v577_v29 = vld [vmem:[%s834_s1 + $0x8] sm:$0xff] }
   0x9   :  { %v221_v36 = vunpack.c.l.b16 %v680_v26  ;;  %v222_v37 = vunpack.c.l.b16 %v682_v27  ;;  %v223_v38 = vunpack.c.l.b16 %v684_v28  ;;  %v164_v46 = vunpack.c.l.b16 %v153_v39 }
   0xa   :  { %v219_v40 = vunpack.c.l.b16 %v690_v31  ;;  %v220_v41 = vunpack.c.l.b16 %v692_v32  ;;  %vm131_vm5 = vcmp.eq.s32.totalorder %v73_v34, 15  ;;  %vm702_vm6 = vcmp.eq.s32.totalorder %v87_v35, 15  ;;  %599 = vmatpush.bf16.msra.mxu2 %v581_v30  ;;  %384 = vmatpush.bf16.msra.mxu0 %v581_v30 }
   0xb   :  { %v225_v43 = vpack.c.b16 %v222_v37, %v221_v36  ;;  %v226_v44 = vpack.c.b16 %v223_v38, %v223_v38  ;;  %vm143_vm7 = vmpackc.low %vm131_vm5, %vm131_vm5  ;;  %407 = vmatpush.bf16.msra.mxu1 %v585_v33  ;;  %v154_v51 = vrot.slane %v153_v39, 4  ;;  %v165_v52 = vunpack.c.h.b16 %v153_v39  ;;  %v576_v38 = vld [vmem:[%s834_s1] sm:$0xff]  ;;  %s618_s1 = smov 32  }
   0xc   :  { %v224_v48 = vpack.c.b16 %v220_v41, %v219_v40  ;;  %vm145_vm8 = vmpackc.low %vm702_vm6, %vm702_vm6  ;;  %v147_v50 = vsel %vm143_vm7, 65537, %v615_v19  ;;  %vm730_vm10 = vcmp.ne.s32.totalorder %v164_v46, %v674_v21 }
   0xd   :  { %v236_v53 = vshll.u32 %v225_v43, 16  ;;  %v240_v54 = vshrl.u32 %v225_v43, 16  ;;  %v244_v55 = vshll.u32 %v226_v44, 16  ;;  %v717_v56 = vsel %vm145_vm8, 65537, %v615_v19 }
   0xe   :  { %v229_v58 = vshrl.u32 %v224_v48, 16  ;;  %v231_v59 = vshll.u32 %v224_v48, 16  ;;  %v155_v60 = vrot.slane %v147_v50, 7  ;;  %v161_v61 = vrot.slane %v717_v56, 7  ;;  %600 = vmatpush.bf16.msra.mxu2 %v580_v45  ;;  %385 = vmatpush.bf16.msra.mxu0 %v580_v45 }
   0xf   :  { %v238_v62 = vrot.slane %v236_v53, 1  ;;  %v246_v63 = vrot.slane %v244_v55, 1  ;;  %vm169_vm11 = vcmp.ne.s32.totalorder %v165_v52, %v709_v47  ;;  %408 = vmatpush.bf16.msra.mxu1 %v584_v49  ;;  %v60_v50 = vadd.s32 16, %v661_v10 }
  0x10   :  { %v233_v2 = vrot.slane %v231_v59, 1  ;;  %v156_v3 = vsel %vm721_vm9, %v154_v51, %v155_v60  ;;  %v157_v4 = vrot.slane %v155_v60, 4  ;;  %v162_v5 = vsel %vm721_vm9, %v154_v51, %v161_v61  ;;  %vm170_vm12 = vmpackc.low %vm169_vm11, %vm730_vm10 }
  0x11   :  { %v242_v6 = vor.u32 %v240_v54, %v238_v62  ;;  %v171_v7 = vunpack.c.l.b16 %v156_v3  ;;  %v172_v8 = vunpack.c.h.b16 %v156_v3  ;;  %v185_v9 = vunpack.c.l.b16 %v162_v5 }
  0x12   :  { %v159_v11 = vsel %vm721_vm9, %v157_v4, %v153_v39  ;;  %v186_v12 = vunpack.c.h.b16 %v162_v5  ;;  %v199_v13 = vsel %vm170_vm12, 0, %v690_v31  ;;  %601 = vmatpush.bf16.msra.mxu2 %v579_v0  ;;  %386 = vmatpush.bf16.msra.mxu0 %v579_v0  ;;  %v234_v19 = vor.u32 %v233_v2, %v229_v58 }
  0x13   :  { %v247_v14 = vsel %vm227_vm4, %v242_v6, %v246_v63  ;;  %vm175_vm13 = vcmp.ne.s32.totalorder %v171_v7, %v674_v21  ;;  %vm176_vm14 = vcmp.ne.s32.totalorder %v172_v8, %v709_v47  ;;  %v178_v15 = vunpack.c.l.b16 %v159_v11 }
  0x14   :  { %250 = vrot.lane.b32.xlu0 %v247_v14, %s616_s12  ;;  %vm177_vm15 = vmpackc.low %vm176_vm14, %vm175_vm13  ;;  %v179_v18 = vunpack.c.h.b16 %v159_v11  ;;  %vm189_vm1 = vcmp.ne.s32.totalorder %v185_v9, %v674_v21  ;;  %vm190_vm2 = vcmp.ne.s32.totalorder %v186_v12, %v709_v47  ;;  %v257_v22 = vunpack.c.l.b16 %v199_v13 }
  0x15   :  { %vm182_vm5 = vcmp.ne.s32.totalorder %v178_v15, %v674_v21  ;;  %vm191_vm6 = vmpackc.low %vm190_vm2, %vm189_vm1  ;;  %v200_v20 = vsel %vm177_vm15, 0, %v692_v32  ;;  %v239_v34 = vsel %vm227_vm4, %v234_v19, %v238_v62  ;;  %vm265_vm9 = vcmask 1046528  }
  0x16   :  { %vm183_vm7 = vcmp.ne.s32.totalorder %v179_v18, %v709_v47  ;;  %v202_v23 = vsel %vm191_vm6, 0, %v682_v27  ;;  %v258_v24 = vunpack.c.l.b16 %v200_v20  ;;  %602 = vmatpush.bf16.msra.mxu2 %v578_v17  ;;  %387 = vmatpush.bf16.msra.mxu0 %v578_v17  ;;  %vm271_vm10 = vcmask 523264  }
  0x17   :  { %vm184_vm8 = vmpackc.low %vm183_vm7, %vm182_vm5  ;;  %v260_v25 = vunpack.c.l.b16 %v202_v23  ;;  %v163_v41 = vrot.slane %v161_v61, 4  ;;  %v80_v51 = vand.u32 15, %v60_v50  ;;  %v66_v52 = vand.u32 15, %v661_v10 }
  0x18   :  { %v201_v30 = vsel %vm184_vm8, 0, %v680_v26  ;;  %v262_v33 = vpack.c.b16 %v258_v24, %v257_v22  ;;  %v127_v56 = vsel %vm666_vm3, 0, %v692_v32  ;;  %v617_v61 = vmov 0.0  }
  0x19   :  { %v259_v35 = vunpack.c.l.b16 %v201_v30  ;;  %v192_v42 = vunpack.c.l.b16 %v163_v41  ;;  %v193_v43 = vunpack.c.h.b16 %v163_v41  ;;  %vm112_vm13 = vcmp.eq.s32.totalorder %v80_v51, 0  ;;  %24 = vst [vmem:[#allocation2] sm:$0x3] %v617_v61 }
  0x1a   :  { %v266_v37 = vrot.slane %v262_v33, 1  ;;  %603 = vmatpush.bf16.msra.mxu2 %v577_v29  ;;  %388 = vmatpush.bf16.msra.mxu0 %v577_v29  ;;  %vm124_vm14 = vmpackc.low %vm112_vm13, %vm112_vm13  ;;  %vm110_vm15 = vcmp.eq.s32.totalorder %v66_v52, 0 }
  0x1b   :  { %v263_v36 = vpack.c.b16 %v260_v25, %v259_v35  ;;  %vm196_vm4 = vcmp.ne.s32.totalorder %v192_v42, %v674_v21  ;;  %vm197_vm11 = vcmp.ne.s32.totalorder %v193_v43, %v709_v47  ;;  %v128_v21 = vsel %vm124_vm14, 0, %v680_v26  ;;  %vm122_vm1 = vmpackc.low %vm110_vm15, %vm110_vm15 }
  0x1c   :  { %248 = vrot.lane.b32.xlu0 %v239_v34, %s616_s12  ;;  %vm198_vm12 = vmpackc.low %vm197_vm11, %vm196_vm4  ;;  %v210_v47 = vunpack.c.l.b16 %v128_v21  ;;  %v126_v55 = vsel %vm122_vm1, 0, %v690_v31  ;;  %v209_v26 = vunpack.c.l.b16 %v127_v56 }
  0x1d   :  { %v267_v39 = vrot.slane %v263_v36, 1  ;;  %v203_v44 = vsel %vm198_vm12, 0, %v684_v28  ;;  %v129_v28 = vsel %vm666_vm3, 0, %v682_v27  ;;  %v208_v58 = vunpack.c.l.b16 %v126_v55 }
  0x1e   :  { %604 = vmatpush.bf16.msra.mxu2 %v576_v38  ;;  %389 = vmatpush.bf16.msra.mxu0 %v576_v38  ;;  %v261_v45 = vunpack.c.l.b16 %v203_v44  ;;  %v211_v53 = vunpack.c.l.b16 %v129_v28 }
  0x1f   :  { %v268_v40 = vsel %vm265_vm9, %v266_v37, %v267_v39  ;;  %v212_v59 = vpack.c.b16 %v209_v26, %v208_v58  ;;  %v475_v26 = vld [vmem:[%s835_s2] sm:$0x1] }
  0x20   :  { %574 = vmatmul.msk.bf16.vlgmr.msra.gmra.mxu1 %vm271_vm10, %v268_v40  ;;  %v264_v46 = vpack.c.b16 %v261_v45, %v261_v45  ;;  %v213_v54 = vpack.c.b16 %v211_v53, %v210_v47  ;;  %v442_v37 = vld [vmem:[#allocation2] sm:$0x3] }
  0x22   :  { %v269_v48 = vrot.slane %v264_v46, 1 }
  0x24   :  { %v270_v49 = vsel %vm265_vm9, %v267_v39, %v269_v48 }
  0x30   :  { %575 = vmatmul.msk.bf16.gmra.mxu1 %vm271_vm10, %v270_v49 }
  0x86   :  { %v251_v57 = vpop.permute.xlu0 %250 }
  0x87   :  { %v278_v10 = vsel %vm271_vm10, %v213_v54, %v251_v57 }
  0x88   :  { %395 = vmatmul.bf16.vlgmr.msra.gmra.mxu2 %v278_v10 }
  0x8e   :  { %v249_v60 = vpop.permute.xlu0 %248 }
  0x8f   :  { %v274_v27 = vsel %vm271_vm10, %v212_v59, %v249_v60 }
  0x90   :  { %390 = vmatmul.bf16.vlgmr.msra.gmra.mxu0 %v274_v27  ;;  %v493_v27 = vld [vmem:[%s836_s3] sm:$0x1] }
  0x9d   :  { %v410_v62 = vpop.f32.mrf.mxu1 }
  0xa5   :  { %v412_v63 = vpop.f32.mrf.mxu1 }
  0xad   :  { %v415_v0 = vpop.f32.mrf.mxu1 }
  0xb5   :  { %v417_v5 = vpop.f32.mrf.mxu1 }
 0x10b   :  { %v396_v31 = vpop.f32.mrf.mxu2 }
 0x10c   :  { %v791_v3 = vadd.f32 %v415_v0, %v396_v31 }
 0x10d   :  { %v391_v1 = vpop.f32.mrf.mxu0 }
 0x10e   :  { %v789_v16 = vadd.f32 %v410_v62, %v391_v1  ;;  %v431_v11 = vmul.f32 %v791_v3, %v791_v3 }
 0x110   :  { %v429_v6 = vmul.f32 %v789_v16, %v789_v16 }
 0x113   :  { %v398_v32 = vpop.f32.mrf.mxu2 }
 0x114   :  { %v797_v7 = vadd.f32 %v417_v5, %v398_v32 }
 0x115   :  { %v393_v2 = vpop.f32.mrf.mxu0 }
 0x116   :  { %v793_v4 = vadd.f32 %v412_v63, %v393_v2  ;;  %v432_v14 = vmul.f32 %v797_v7, %v797_v7 }
 0x118   :  { %v420_v8 = vadd.f32 %v793_v4, %v789_v16  ;;  %v430_v9 = vmul.f32 %v793_v4, %v793_v4 }
 0x11a   :  { %v421_v12 = vadd.f32 %v420_v8, %v791_v3  ;;  %v433_v13 = vadd.f32 %v430_v9, %v429_v6 }
 0x11c   :  { %v422_v15 = vadd.f32 %v421_v12, %v797_v7  ;;  %v434_v17 = vadd.f32 %v433_v13, %v431_v11 }
 0x11e   :  { %v423_v18 = vrot.slane %v422_v15, 4  ;;  %v435_v19 = vadd.f32 %v434_v17, %v432_v14 }
 0x120   :  { %v424_v20 = vadd.f32 %v423_v18, %v422_v15  ;;  %v436_v22 = vrot.slane %v435_v19, 4 }
 0x122   :  { %v425_v23 = vrot.slane %v424_v20, 2  ;;  %v437_v24 = vadd.f32 %v436_v22, %v435_v19 }
 0x124   :  { %v426_v25 = vadd.f32 %v425_v23, %v424_v20  ;;  %v438_v29 = vrot.slane %v437_v24, 2 }
 0x126   :  { %v427_v30 = vrot.slane %v426_v25, 1  ;;  %v439_v33 = vadd.f32 %v438_v29, %v437_v24 }
 0x128   :  { %v440_v34 = vrot.slane %v439_v33, 1  ;;  %v428_v35 = vadd.f32 %v427_v30, %v426_v25 }
 0x12a   :  { %v441_v36 = vadd.f32 %v440_v34, %v439_v33 }
 0x12c   :  { %v443_v38 = vsel %vm37_vm0, %v428_v35, %v441_v36 }
 0x12d   :  { %v444_v39 = vadd.f32 %v443_v38, %v442_v37 }
 0x12f   :  { %445 = vst [vmem:[#allocation2] sm:$0x3] %v444_v39 }
 0x136   :  { %v455_v40 = vld [vmem:[#allocation2] sm:$0x3] }
 0x137   :  { %456 = vrot.lane.b32.xlu1 %v455_v40, %s616_s12 }
 0x1a9   :  { %v457_v41 = vpop.permute.xlu1 %456 }
 0x1aa   :  { %v458_v42 = vadd.f32 %v457_v41, %v455_v40 }
 0x1ac   :  { %459 = vrot.lane.b32.xlu1 %v458_v42, %s618_s1 }
 0x21e   :  { %v460_v43 = vpop.permute.xlu1 %459 }
 0x21f   :  { %v461_v44 = vadd.f32 %v460_v43, %v458_v42 }
 0x221   :  { %462 = vrot.lane.b32.xlu2 %v461_v44, %s619_s17 }
 0x27b   :  { %v463_v45 = vpop.permute.xlu2 %462 }
 0x27c   :  { %v464_v46 = vadd.f32 %v463_v45, %v461_v44 }
 0x27e   :  { %465 = vrot.lane.b32.xlu2 %v464_v46, %s620_s18 }
 0x2d8   :  { %v466_v48 = vpop.permute.xlu2 %465 }
 0x2d9   :  { %v467_v49 = vadd.f32 %v466_v48, %v464_v46 }
 0x2db   :  { %v468_v50 = vmul.f32 0.001953125, %v467_v49 }
 0x2dd   :  { %v469_v51 = vmul.f32 %v468_v50, %v468_v50 }
 0x2df   :  { %v471_v52 = vrot.slane %v469_v51, 7 }
 0x2e1   :  { %v473_v21 = vsub.f32 %v468_v50, %v471_v52 }
 0x2e3   :  { %v474_v28 = vmax.f32 %v473_v21, 0.0 }
 0x2e5   :  { %v476_v47 = vadd.f32 1e-05, %v474_v28 }
 0x2e7   :  { %612 = vrsqrt.f32 %v476_v47  ;;  %vm483_vm3 = vweird.f32 %v476_v47 }
 0x2ed   :  { %v613_v53 = vpop.eup %612 }
 0x2ee   :  { %v478_v54 = vmul.f32 %v613_v53, %v476_v47  ;;  %vm484_vm0 = vweird.f32 %v613_v53 }
 0x2ef   :  { %vm485_vm2 = vmor %vm483_vm3, %vm484_vm0 }
 0x2f0   :  { %v479_v55 = vmul.f32 %v613_v53, %v478_v54 }
 0x2f2   :  { %v480_v56 = vmul.f32 0.5, %v479_v55 }
 0x2f4   :  { %v481_v57 = vsub.f32 1.5, %v480_v56 }
 0x2f6   :  { %v482_v10 = vmul.f32 %v613_v53, %v481_v57 }
 0x2f8   :  { %v486_v58 = vsel %vm485_vm2, %v613_v53, %v482_v10 }
 0x2f9   :  { %488 = vst [vmem:[#allocation1] sm:$0xff] %v486_v58 }
 0x300   :  { %v490_v59 = vld [vmem:[#allocation1 + $0x1] ss:$9 sm:$0xff] }
 0x301   :  { %v492_v60 = vmul.f32 %v490_v59, %v475_v26 }
 0x303   :  { %v494_v61 = vmul.f32 %v492_v60, %v468_v50  ;;  %v501_v62 = vperm.slane %v492_v60, 0 }
 0x305   :  { %v495_v63 = vsub.f32 %v493_v27, %v494_v61  ;;  %v503_v31 = vmul.f32 %v501_v62, %v789_v16  ;;  %v504_v0 = vmul.f32 %v501_v62, %v793_v4  ;;  %v505_v1 = vmul.f32 %v501_v62, %v791_v3 }
 0x306   :  { %v506_v32 = vmul.f32 %v501_v62, %v797_v7 }
 0x307   :  { %v508_v2 = vperm.slane %v495_v63, 0 }
 0x309   :  { %v510_v5 = vadd.f32 %v508_v2, %v503_v31  ;;  %v511_v6 = vadd.f32 %v508_v2, %v504_v0  ;;  %v512_v8 = vadd.f32 %v508_v2, %v505_v1  ;;  %v513_v9 = vadd.f32 %v508_v2, %v506_v32 }
 0x30b   :  { %v514_v11 = vmax.f32 %v510_v5, 0.0  ;;  %v515_v12 = vmax.f32 %v511_v6, 0.0  ;;  %v516_v13 = vmax.f32 %v512_v8, 0.0  ;;  %v517_v14 = vmax.f32 %v513_v9, 0.0 }
 0x30d   :  { %518 = vst [vmem:[%s837_s4] sm:$0xff] %v514_v11 }
 0x30e   :  { %519 = vst [vmem:[%s837_s4 + $0x8] sm:$0xff] %v515_v12 }
 0x30f   :  { %520 = vst [vmem:[%s837_s4 + $0x10] sm:$0xff] %v516_v13 }
 0x310   :  { %521 = vst [vmem:[%s837_s4 + $0x18] sm:$0xff] %v517_v14 }

</bundles_post_ra>
